<compile_context>
chip_gen: v6e
topology: v6e:2x2x1
jax: 0.10.0
libtpu: 0.0.40
codegen_flags: <defaults>
</compile_context>

<pallas_src>
import functools

import jax
import jax.numpy as jnp
from jax import lax
from jax.experimental import pallas as pl
from jax.experimental.pallas import tpu as pltpu


def _round_up(x, m):
    return (x + m - 1) // m * m


def _pick_tile_k(d_pad, cap=1024):
    """Largest multiple of 128 that divides d_pad and is <= cap."""
    m = d_pad // 128
    for t in range(min(m, max(1, cap // 128)), 0, -1):
        if m % t == 0:
            return 128 * t
    return 128


def _pick_tile_b(b, cap=256):
    """Return (tile_b, b_pad): tile_b multiple of 8, <= cap, dividing b_pad."""
    b_pad = _round_up(b, 8)
    if b_pad <= cap:
        return b_pad, b_pad                     # single batch tile
    for t in range(cap, 7, -8):
        if b_pad % t == 0:
            return t, b_pad
    return cap, _round_up(b, cap)


def _make_kernel(n_images, num_k, tile_b, out_pad, n_out):
    def kernel(x_ref, wf_ref, bf_ref, wl_ref, bl_ref, out_ref, acc_ref):
        # grid = (batch tile i [parallel], K tile k, image j [innermost]).
        # j innermost => the w_feat block (index depends only on k) is NOT re-DMA'd
        # across images: one pass over w_feat per batch tile.
        k = pl.program_id(1)
        j = pl.program_id(2)

        @pl.when(jnp.logical_and(k == 0, j == 0))
        def _init():
            acc_ref[...] = jnp.zeros_like(acc_ref)

        # Backbone partial product: cast x tile to bf16 in-kernel, f32 accumulate.
        xb = x_ref[...].astype(jnp.bfloat16)                 # (tile_b, tile_k)
        acc_ref[j] += jnp.dot(xb, wf_ref[...],               # (tile_k, feat)
                              preferred_element_type=jnp.float32)

        @pl.when(jnp.logical_and(k == num_k - 1, j == n_images - 1))
        def _finalize():
            bias_f = bf_ref[...]                             # (1, feat) f32
            logits = jnp.zeros((tile_b, out_pad), jnp.float32) + bl_ref[...]
            for jj in range(n_images):                       # static; head is tiny
                fj = acc_ref[jj] + bias_f                    # (tile_b, feat) f32
                logits = logits + jnp.dot(fj, wl_ref[jj],
                                          preferred_element_type=jnp.float32)
            h = jnp.maximum(logits, 0.0)                     # F.relu
            # log_softmax over the n_out valid columns; padded lanes masked out.
            col = lax.broadcasted_iota(jnp.int32, (tile_b, out_pad), 1)
            valid = col < n_out
            m = jnp.max(jnp.where(valid, h, -jnp.inf), axis=1, keepdims=True)
            e = jnp.where(valid, jnp.exp(h - m), 0.0)
            lse = jnp.log(jnp.sum(e, axis=1, keepdims=True))
            out_ref[...] = jnp.where(valid, h - m - lse, 0.0)

    return kernel


def prepare_params(params, *, n_images, d_img, feat_dim, n_out=2):
    """One-time weight prep (pad + cast), done OUTSIDE the jitted forward."""
    d_pad = _round_up(d_img, 128)
    out_pad = _round_up(n_out, 128)
    wf = jnp.zeros((d_pad, feat_dim), jnp.bfloat16)
    wf = wf.at[:d_img, :].set(params["w_feat"].astype(jnp.bfloat16))
    bf = params["b_feat"].reshape(1, feat_dim).astype(jnp.float32)
    wl = jnp.zeros((n_images, feat_dim, out_pad), jnp.float32)
    wl = wl.at[:, :, :n_out].set(
        params["w_lin"].reshape(n_images, feat_dim, n_out).astype(jnp.float32))
    bl = jnp.zeros((1, out_pad), jnp.float32)
    bl = bl.at[0, :n_out].set(params["b_lin"].reshape(-1).astype(jnp.float32))
    return {"wf": wf, "bf": bf, "wl": wl, "bl": bl}


def image_model_forward(x, prep, *, n_images, channels, height, width, feat_dim,
                        n_out=2, tile_b_cap=256, tile_k_cap=1024):
    """JAX/Pallas equivalent of ImageModel.forward.

    x: (B, n_images, C, H, W) float32; prep: output of prepare_params().
    Returns (B, n_out) log-probabilities.
    """
    B = x.shape[0]
    d_img = channels * height * width
    d_pad = _round_up(d_img, 128)
    out_pad = _round_up(n_out, 128)

    tile_k = _pick_tile_k(d_pad, tile_k_cap)
    kpb = d_pad // tile_k                                   # K tiles per image
    tile_b, b_pad = _pick_tile_b(B, tile_b_cap)

    # Free contiguous view of x; zero-pad only when strictly required.
    x3 = x.reshape(B, n_images, d_img)
    if d_pad != d_img or b_pad != B:
        x3 = jnp.pad(x3, ((0, b_pad - B), (0, 0), (0, d_pad - d_img)))
    x2 = x3.reshape(b_pad, n_images * d_pad)

    num_i = b_pad // tile_b
    grid = (num_i, kpb, n_images)

    flops = (2 * b_pad * n_images * d_pad * feat_dim
             + 2 * b_pad * n_images * feat_dim * out_pad)
    bytes_accessed = (b_pad * n_images * d_pad * 4          # x: one pass (f32)
                      + num_i * d_pad * feat_dim * 2        # w_feat: once per b-tile
                      + n_images * feat_dim * out_pad * 4   # head weights
                      + (feat_dim + 2 * out_pad) * 4        # biases
                      + b_pad * out_pad * 4)                # output

    out_padded = pl.pallas_call(
        _make_kernel(n_images, kpb, tile_b, out_pad, n_out),
        out_shape=jax.ShapeDtypeStruct((b_pad, out_pad), jnp.float32),
        grid_spec=pltpu.PrefetchScalarGridSpec(
            num_scalar_prefetch=0,
            grid=grid,
            in_specs=[
                # x: (tile_b, tile_k) block at column (image j, K tile k).
                pl.BlockSpec((tile_b, tile_k), lambda i, k, j: (i, j * kpb + k)),
                # w_feat: depends only on k -> reused across the inner image axis.
                pl.BlockSpec((tile_k, feat_dim), lambda i, k, j: (k, 0)),
                pl.BlockSpec((1, feat_dim), lambda i, k, j: (0, 0)),
                pl.BlockSpec((n_images, feat_dim, out_pad),
                             lambda i, k, j: (0, 0, 0)),
                pl.BlockSpec((1, out_pad), lambda i, k, j: (0, 0)),
            ],
            out_specs=pl.BlockSpec((tile_b, out_pad), lambda i, k, j: (i, 0)),
            scratch_shapes=[pltpu.VMEM((n_images, tile_b, feat_dim), jnp.float32)],
        ),
        compiler_params=pltpu.CompilerParams(
            dimension_semantics=("parallel", "arbitrary", "arbitrary"),
            vmem_limit_bytes=32 * 1024 * 1024),
        cost_estimate=pl.CostEstimate(
            flops=flops,
            transcendentals=b_pad * (out_pad + 1),
            bytes_accessed=bytes_accessed),
    )(x2, prep["wf"], prep["bf"], prep["wl"], prep["bl"])

    return out_padded[:B, :n_out]


if __name__ == "__main__":
    # Small shapes consistent with the module's forward:
    #   B=2 samples, n_images=4 images/sample, 3x16x16 images, feat_dim=32
    #   => linear_size = feat_dim * n_images = 128, output = (B, 2)
    B, n_images, C, H, W = 2, 4, 3, 16, 16
    feat_dim = 32
    d_img = C * H * W
    linear_size = feat_dim * n_images

    key = jax.random.PRNGKey(0)
    k1, k2, k3, k4, k5 = jax.random.split(key, 5)

    bound_f = 1.0 / float(d_img) ** 0.5
    bound_l = 1.0 / float(linear_size) ** 0.5
    params = {
        "w_feat": jax.random.uniform(k1, (d_img, feat_dim), jnp.float32, -bound_f, bound_f),
        "b_feat": jax.random.uniform(k2, (feat_dim,), jnp.float32, -bound_f, bound_f),
        "w_lin": jax.random.uniform(k3, (linear_size, 2), jnp.float32, -bound_l, bound_l),
        "b_lin": jax.random.uniform(k4, (2,), jnp.float32, -bound_l, bound_l),
    }
    x = jax.random.normal(k5, (B, n_images, C, H, W), jnp.float32)

    # One-time weight prep (pad + bf16 cast) outside the jitted forward.
    prep = prepare_params(params, n_images=n_images, d_img=d_img,
                          feat_dim=feat_dim, n_out=2)

    fwd = jax.jit(functools.partial(
        image_model_forward, n_images=n_images, channels=C, height=H, width=W,
        feat_dim=feat_dim))
    out = jax.block_until_ready(fwd(x, prep))
    assert out.shape == (B, 2), out.shape

    # Pure-JAX f32 reference of the same forward (bf16 backbone => loose tol).
    feats = x.reshape(B * n_images, d_img) @ params["w_feat"] + params["b_feat"]
    h_ref = jnp.maximum(
        feats.reshape(B, linear_size) @ params["w_lin"] + params["b_lin"], 0.0)
    ref = jax.nn.log_softmax(h_ref, axis=1)

    assert bool(jnp.all(jnp.abs(jnp.sum(jnp.exp(out), axis=1) - 1.0) < 1e-5))
    err = float(jnp.max(jnp.abs(out - ref)))
    assert err < 5e-2, err
    print("KERNEL_OK")
</pallas_src>

<mosaic_0001>
module attributes {stable_mosaic.version = 11 : i64} {
  func.func @kernel(%arg0: i32, %arg1: i32, %arg2: i32, %arg3: memref<8x768xf32, #tpu.memory_space<vmem>>, %arg4: memref<768x32xbf16, #tpu.memory_space<vmem>>, %arg5: memref<1x32xf32, #tpu.memory_space<vmem>>, %arg6: memref<4x32x128xf32, #tpu.memory_space<vmem>>, %arg7: memref<1x128xf32, #tpu.memory_space<vmem>>, %arg8: memref<8x128xf32, #tpu.memory_space<vmem>>, %arg9: memref<4x8x32xf32, #tpu.memory_space<vmem>>) attributes {dimension_semantics = [#tpu.dimension_semantics<parallel>, #tpu.dimension_semantics<arbitrary>, #tpu.dimension_semantics<arbitrary>], iteration_bounds = array<i64: 1, 1, 4>, scalar_prefetch = 0 : i64, scratch_operands = 1 : i64, tpu.core_type = #tpu.core_type<tc>, window_params = [{transform_indices = @transform_0, window_bounds = array<i64: 8, 768>}, {transform_indices = @transform_1, window_bounds = array<i64: 768, 32>}, {pipeline_mode = #tpu.pipeline_mode<synchronous>, transform_indices = @transform_2, window_bounds = array<i64: 1, 32>}, {pipeline_mode = #tpu.pipeline_mode<synchronous>, transform_indices = @transform_3, window_bounds = array<i64: 4, 32, 128>}, {pipeline_mode = #tpu.pipeline_mode<synchronous>, transform_indices = @transform_4, window_bounds = array<i64: 1, 128>}, {transform_indices = @transform_5, window_bounds = array<i64: 8, 128>}]} {
    %c0_i32 = arith.constant 0 : i32
    %0 = arith.cmpi eq, %arg1, %c0_i32 : i32
    %c0_i32_0 = arith.constant 0 : i32
    %1 = arith.cmpi eq, %arg2, %c0_i32_0 : i32
    %2 = arith.andi %0, %1 : i1
    %3 = arith.extui %2 : i1 to i32
    %c0_i32_1 = arith.constant 0 : i32
    %4 = arith.cmpi ne, %3, %c0_i32_1 : i32
    scf.if %4 {
      %cst_11 = arith.constant 0.000000e+00 : f32
      %22 = vector.broadcast %cst_11 : f32 to vector<4x8x32xf32>
      %c0_12 = arith.constant 0 : index
      %c0_13 = arith.constant 0 : index
      %c0_14 = arith.constant 0 : index
      %23 = vector.load %arg9[%c0_12, %c0_13, %c0_14] : memref<4x8x32xf32, #tpu.memory_space<vmem>>, vector<4x8x32xf32>
      tpu.vector_store %arg9[%c0_12, %c0_13, %c0_14], %22 {strides = array<i32>} : memref<4x8x32xf32, #tpu.memory_space<vmem>>, vector<4x8x32xf32>,
    } else {
    }
    %c0 = arith.constant 0 : index
    %c0_2 = arith.constant 0 : index
    %5 = vector.load %arg3[%c0, %c0_2] : memref<8x768xf32, #tpu.memory_space<vmem>>, vector<8x768xf32>
    %6 = arith.truncf %5 : vector<8x768xf32> to vector<8x768xbf16>
    %7 = arith.index_cast %arg2 : i32 to index
    %c0_3 = arith.constant 0 : index
    %c0_4 = arith.constant 0 : index
    %8 = vector.load %arg9[%7, %c0_3, %c0_4] : memref<4x8x32xf32, #tpu.memory_space<vmem>>, vector<1x8x32xf32>
    %9 = vector.shape_cast %8 : vector<1x8x32xf32> to vector<8x32xf32>
    %c0_5 = arith.constant 0 : index
    %c0_6 = arith.constant 0 : index
    %10 = vector.load %arg4[%c0_5, %c0_6] : memref<768x32xbf16, #tpu.memory_space<vmem>>, vector<768x32xbf16>
    %cst = arith.constant dense<0.000000e+00> : vector<8x32xf32>
    %11 = tpu.matmul %6, %10, %cst {dimension_numbers = #tpu.dot_dimension_numbers<[1], [0], [0], [1], [0, 0, 1, 1], [], []>} : vector<8x768xbf16>, vector<768x32xbf16>, vector<8x32xf32> -> vector<8x32xf32>
    %12 = arith.addf %9, %11 : vector<8x32xf32>
    %13 = arith.index_cast %arg2 : i32 to index
    %c0_7 = arith.constant 0 : index
    %c0_8 = arith.constant 0 : index
    %14 = vector.load %arg9[%13, %c0_7, %c0_8] : memref<4x8x32xf32, #tpu.memory_space<vmem>>, vector<1x8x32xf32>
    %15 = vector.shape_cast %14 : vector<1x8x32xf32> to vector<8x32xf32>
    %16 = vector.shape_cast %12 : vector<8x32xf32> to vector<1x8x32xf32>
    tpu.vector_store %arg9[%13, %c0_7, %c0_8], %16 {strides = array<i32>} : memref<4x8x32xf32, #tpu.memory_space<vmem>>, vector<1x8x32xf32>,
    %c0_i32_9 = arith.constant 0 : i32
    %17 = arith.cmpi eq, %arg1, %c0_i32_9 : i32
    %c3_i32 = arith.constant 3 : i32
    %18 = arith.cmpi eq, %arg2, %c3_i32 : i32
    %19 = arith.andi %17, %18 : i1
    %20 = arith.extui %19 : i1 to i32
    %c0_i32_10 = arith.constant 0 : i32
    %21 = arith.cmpi ne, %20, %c0_i32_10 : i32
    scf.if %21 {
      %c0_11 = arith.constant 0 : index
      %c0_12 = arith.constant 0 : index
      %22 = vector.load %arg5[%c0_11, %c0_12] : memref<1x32xf32, #tpu.memory_space<vmem>>, vector<1x32xf32>
      %cst_13 = arith.constant 0.000000e+00 : f32
      %23 = vector.broadcast %cst_13 : f32 to vector<8x128xf32>
      %c0_14 = arith.constant 0 : index
      %c0_15 = arith.constant 0 : index
      %24 = vector.load %arg7[%c0_14, %c0_15] : memref<1x128xf32, #tpu.memory_space<vmem>>, vector<1x128xf32>
      %25 = vector.broadcast %24 : vector<1x128xf32> to vector<8x128xf32>
      %26 = arith.addf %23, %25 : vector<8x128xf32>
      %c0_16 = arith.constant 0 : index
      %c0_17 = arith.constant 0 : index
      %c0_18 = arith.constant 0 : index
      %27 = vector.load %arg9[%c0_16, %c0_17, %c0_18] : memref<4x8x32xf32, #tpu.memory_space<vmem>>, vector<1x8x32xf32>
      %28 = vector.shape_cast %27 : vector<1x8x32xf32> to vector<8x32xf32>
      %29 = vector.broadcast %22 : vector<1x32xf32> to vector<8x32xf32>
      %30 = arith.addf %28, %29 : vector<8x32xf32>
      %c0_19 = arith.constant 0 : index
      %c0_20 = arith.constant 0 : index
      %c0_21 = arith.constant 0 : index
      %31 = vector.load %arg6[%c0_19, %c0_20, %c0_21] : memref<4x32x128xf32, #tpu.memory_space<vmem>>, vector<1x32x128xf32>
      %32 = vector.shape_cast %31 : vector<1x32x128xf32> to vector<32x128xf32>
      %cst_22 = arith.constant dense<0.000000e+00> : vector<8x128xf32>
      %33 = tpu.matmul %30, %32, %cst_22 {dimension_numbers = #tpu.dot_dimension_numbers<[1], [0], [0], [1], [0, 0, 1, 1], [], []>} : vector<8x32xf32>, vector<32x128xf32>, vector<8x128xf32> -> vector<8x128xf32>
      %34 = arith.addf %26, %33 : vector<8x128xf32>
      %c1 = arith.constant 1 : index
      %c0_23 = arith.constant 0 : index
      %c0_24 = arith.constant 0 : index
      %35 = vector.load %arg9[%c1, %c0_23, %c0_24] : memref<4x8x32xf32, #tpu.memory_space<vmem>>, vector<1x8x32xf32>
      %36 = vector.shape_cast %35 : vector<1x8x32xf32> to vector<8x32xf32>
      %37 = vector.broadcast %22 : vector<1x32xf32> to vector<8x32xf32>
      %38 = arith.addf %36, %37 : vector<8x32xf32>
      %c1_25 = arith.constant 1 : index
      %c0_26 = arith.constant 0 : index
      %c0_27 = arith.constant 0 : index
      %39 = vector.load %arg6[%c1_25, %c0_26, %c0_27] : memref<4x32x128xf32, #tpu.memory_space<vmem>>, vector<1x32x128xf32>
      %40 = vector.shape_cast %39 : vector<1x32x128xf32> to vector<32x128xf32>
      %cst_28 = arith.constant dense<0.000000e+00> : vector<8x128xf32>
      %41 = tpu.matmul %38, %40, %cst_28 {dimension_numbers = #tpu.dot_dimension_numbers<[1], [0], [0], [1], [0, 0, 1, 1], [], []>} : vector<8x32xf32>, vector<32x128xf32>, vector<8x128xf32> -> vector<8x128xf32>
      %42 = arith.addf %34, %41 : vector<8x128xf32>
      %c2 = arith.constant 2 : index
      %c0_29 = arith.constant 0 : index
      %c0_30 = arith.constant 0 : index
      %43 = vector.load %arg9[%c2, %c0_29, %c0_30] : memref<4x8x32xf32, #tpu.memory_space<vmem>>, vector<1x8x32xf32>
      %44 = vector.shape_cast %43 : vector<1x8x32xf32> to vector<8x32xf32>
      %45 = vector.broadcast %22 : vector<1x32xf32> to vector<8x32xf32>
      %46 = arith.addf %44, %45 : vector<8x32xf32>
      %c2_31 = arith.constant 2 : index
      %c0_32 = arith.constant 0 : index
      %c0_33 = arith.constant 0 : index
      %47 = vector.load %arg6[%c2_31, %c0_32, %c0_33] : memref<4x32x128xf32, #tpu.memory_space<vmem>>, vector<1x32x128xf32>
      %48 = vector.shape_cast %47 : vector<1x32x128xf32> to vector<32x128xf32>
      %cst_34 = arith.constant dense<0.000000e+00> : vector<8x128xf32>
      %49 = tpu.matmul %46, %48, %cst_34 {dimension_numbers = #tpu.dot_dimension_numbers<[1], [0], [0], [1], [0, 0, 1, 1], [], []>} : vector<8x32xf32>, vector<32x128xf32>, vector<8x128xf32> -> vector<8x128xf32>
      %50 = arith.addf %42, %49 : vector<8x128xf32>
      %c3 = arith.constant 3 : index
      %c0_35 = arith.constant 0 : index
      %c0_36 = arith.constant 0 : index
      %51 = vector.load %arg9[%c3, %c0_35, %c0_36] : memref<4x8x32xf32, #tpu.memory_space<vmem>>, vector<1x8x32xf32>
      %52 = vector.shape_cast %51 : vector<1x8x32xf32> to vector<8x32xf32>
      %53 = vector.broadcast %22 : vector<1x32xf32> to vector<8x32xf32>
      %54 = arith.addf %52, %53 : vector<8x32xf32>
      %c3_37 = arith.constant 3 : index
      %c0_38 = arith.constant 0 : index
      %c0_39 = arith.constant 0 : index
      %55 = vector.load %arg6[%c3_37, %c0_38, %c0_39] : memref<4x32x128xf32, #tpu.memory_space<vmem>>, vector<1x32x128xf32>
      %56 = vector.shape_cast %55 : vector<1x32x128xf32> to vector<32x128xf32>
      %cst_40 = arith.constant dense<0.000000e+00> : vector<8x128xf32>
      %57 = tpu.matmul %54, %56, %cst_40 {dimension_numbers = #tpu.dot_dimension_numbers<[1], [0], [0], [1], [0, 0, 1, 1], [], []>} : vector<8x32xf32>, vector<32x128xf32>, vector<8x128xf32> -> vector<8x128xf32>
      %58 = arith.addf %50, %57 : vector<8x128xf32>
      %cst_41 = arith.constant 0.000000e+00 : f32
      %59 = vector.broadcast %cst_41 : f32 to vector<8x128xf32>
      %60 = arith.maximumf %58, %59 : vector<8x128xf32>
      %61 = tpu.iota {dimensions = array<i32: 1>} : vector<8x128xi32>
      %c2_i32 = arith.constant 2 : i32
      %62 = vector.broadcast %c2_i32 : i32 to vector<8x128xi32>
      %63 = arith.cmpi slt, %61, %62 : vector<8x128xi32>
      %cst_42 = arith.constant 0xFF800000 : f32
      %64 = vector.broadcast %cst_42 : f32 to vector<8x128xf32>
      %65 = arith.select %63, %60, %64 : vector<8x128xi1>, vector<8x128xf32>
      %cst_43 = arith.constant dense<0xFF800000> : vector<8xf32>
      %66 = vector.multi_reduction <maximumf>, %65, %cst_43 [1] : vector<8x128xf32> to vector<8xf32>
      %67 = vector.shape_cast %66 : vector<8xf32> to vector<8x1xf32>
      %68 = vector.broadcast %67 : vector<8x1xf32> to vector<8x128xf32>
      %69 = arith.subf %60, %68 : vector<8x128xf32>
      %70 = math.exp %69 : vector<8x128xf32>
      %cst_44 = arith.constant 0.000000e+00 : f32
      %71 = vector.broadcast %cst_44 : f32 to vector<8x128xf32>
      %72 = arith.select %63, %70, %71 : vector<8x128xi1>, vector<8x128xf32>
      %cst_45 = arith.constant dense<0.000000e+00> : vector<8xf32>
      %73 = vector.multi_reduction <add>, %72, %cst_45 [1] : vector<8x128xf32> to vector<8xf32>
      %74 = vector.shape_cast %73 : vector<8xf32> to vector<8x1xf32>
      %75 = math.log %74 : vector<8x1xf32>
      %76 = vector.broadcast %67 : vector<8x1xf32> to vector<8x128xf32>
      %77 = arith.subf %60, %76 : vector<8x128xf32>
      %78 = vector.broadcast %75 : vector<8x1xf32> to vector<8x128xf32>
      %79 = arith.subf %77, %78 : vector<8x128xf32>
      %cst_46 = arith.constant 0.000000e+00 : f32
      %80 = vector.broadcast %cst_46 : f32 to vector<8x128xf32>
      %81 = arith.select %63, %79, %80 : vector<8x128xi1>, vector<8x128xf32>
      %c0_47 = arith.constant 0 : index
      %c0_48 = arith.constant 0 : index
      %82 = vector.load %arg8[%c0_47, %c0_48] : memref<8x128xf32, #tpu.memory_space<vmem>>, vector<8x128xf32>
      tpu.vector_store %arg8[%c0_47, %c0_48], %81 {strides = array<i32>} : memref<8x128xf32, #tpu.memory_space<vmem>>, vector<8x128xf32>,
    } else {
    }
    return
  }
  func.func @transform_0(%arg0: i32, %arg1: i32, %arg2: i32) -> (i32, i32) {
    %c1_i32 = arith.constant 1 : i32
    %0 = arith.muli %arg2, %c1_i32 : i32
    %1 = arith.addi %0, %arg1 : i32
    %c0_i32 = arith.constant 0 : i32
    return %arg0, %1 : i32, i32
  }
  func.func @transform_1(%arg0: i32, %arg1: i32, %arg2: i32) -> (i32, i32) {
    %c0_i32 = arith.constant 0 : i32
    %c0_i32_0 = arith.constant 0 : i32
    return %arg1, %c0_i32 : i32, i32
  }
  func.func @transform_2(%arg0: i32, %arg1: i32, %arg2: i32) -> (i32, i32) {
    %c0_i32 = arith.constant 0 : i32
    %c0_i32_0 = arith.constant 0 : i32
    %c0_i32_1 = arith.constant 0 : i32
    return %c0_i32, %c0_i32_0 : i32, i32
  }
  func.func @transform_3(%arg0: i32, %arg1: i32, %arg2: i32) -> (i32, i32, i32) {
    %c0_i32 = arith.constant 0 : i32
    %c0_i32_0 = arith.constant 0 : i32
    %c0_i32_1 = arith.constant 0 : i32
    %c0_i32_2 = arith.constant 0 : i32
    return %c0_i32, %c0_i32_0, %c0_i32_1 : i32, i32, i32
  }
  func.func @transform_4(%arg0: i32, %arg1: i32, %arg2: i32) -> (i32, i32) {
    %c0_i32 = arith.constant 0 : i32
    %c0_i32_0 = arith.constant 0 : i32
    %c0_i32_1 = arith.constant 0 : i32
    return %c0_i32, %c0_i32_0 : i32, i32
  }
  func.func @transform_5(%arg0: i32, %arg1: i32, %arg2: i32) -> (i32, i32) {
    %c0_i32 = arith.constant 0 : i32
    %c0_i32_0 = arith.constant 0 : i32
    return %arg0, %c0_i32 : i32, i32
  }
}

</mosaic_0001>

<bundles_post_ra>
// kernel: image_model_forward.1
= control target key start
LH: loop header
LB: loop body
LE: loop exit
PB: predicated region body
PF: predicated region fallthrough
CT: control target
= control target key end

     0   :  { %s1616_s18 = smov 0   ;;  %s1618_s19 = smov 0   ;;  %s1875_s0 = inlined_call_operand.vmem [shape: f32[8,3072], index: 0, kind: input, shape index: {}]   ;;  %s1876_s1 = inlined_call_operand.vmem [shape: bf16[768,32], index: 1, kind: input, shape index: {}]   ;;  %s1877_s2 = inlined_call_operand.vmem [shape: f32[1,32], index: 2, kind: input, shape index: {}]   ;;  %s1878_s3 = inlined_call_operand.vmem [shape: f32[4,32,128], index: 3, kind: input, shape index: {}]   ;;  %s1879_s4 = inlined_call_operand.vmem [shape: f32[1,128], index: 4, kind: input, shape index: {}]   ;;  %s1880_s5 = inlined_call_operand.vmem [shape: f32[8,128], index: 5, kind: output, shape index: {}]  }
   0x1   :  { %s1620_s20 = smov 0  }
   0x2 LB: > { %s27_s21 = sadd.s32 1, %s1577_s19  ;;  %p1274_p0 = scmp.ge.s32.totalorder %s1581_s20, 1  ;;  %s1581_s20 = sphi %s1620_s20, %s15_s20   ;;  %s1577_s19 = sphi %s1618_s19, %s1882_s19   ;;  %s1573_s18 = sphi %s1616_s18, %s1881_s18  }
   0x3   : > { %p28_p1 = scmp.ge.s32.totalorder %s27_s21, 4  ;;  %p228_p2 = scmp.lt.s32.totalorder %s1581_s20, 5 }
   0x5   : > { %s1884_s21 = smov (%p28_p1, %s27_s21), 0  ;;  %p229_p3 = pnand %p1274_p0, %p228_p2 }
   0x6   : > { %s266_s22 = smul.u32 (!%p229_p3), 6, %s1573_s18  ;;  %p289_p4 = scmp.eq.s32.totalorder (!%p229_p3), %s1573_s18, 0 }
   0x7   : > { %232 = sbr.rel (%p229_p3) target bundleno = 818 (0x332), region = 40 }
   0x8   : > { %p269_p5 = scmp.lt.s32.totalorder (!%p229_p3), %s266_s22, 23 }
   0xc   : > { %s1886_s22 = smov (!%p269_p5, %s266_s22), 23  ;;  %293 = sbr.rel (!%p289_p4) target bundleno = 17 (0x11), region = 44  ;;  %vm294_vm0 = vcmask (%p289_p4), 261120   ;;  %v1583_v0 = vmov (%p289_p4), 0.0  }
   0xd   : > { %s1275_s23 = sshll.u32 %s1886_s22, 3  ;;  %295 = vst.msk [vmem:[#allocation2] sm:$0xff] (%p289_p4), %vm294_vm0, %v1583_v0  ;;  %296 = vst.msk [vmem:[#allocation2 + $0x8] sm:$0xff] (%p289_p4), %vm294_vm0, %v1583_v0 }
   0xe   : > { %s1641_s26 = scalar_lea.vmem %s1875_s0, %s1275_s23  ;;  %297 = vst.msk [vmem:[#allocation2 + $0x10] sm:$0xff] (%p289_p4), %vm294_vm0, %v1583_v0  ;;  %298 = vst.msk [vmem:[#allocation2 + $0x18] sm:$0xff] (%p289_p4), %vm294_vm0, %v1583_v0 }
  0x11 PF: > { %v1507_v1 = vld [vmem:[%s1876_s1 + $0x78] sm:$0xff]   ;;  %v1511_v5 = vld [vmem:[%s1876_s1 + $0x70] sm:$0xff]   ;;  %v1515_v9 = vld [vmem:[%s1876_s1 + $0x68] sm:$0xff]   ;;  %p821_p6 = scmp.eq.s32.totalorder %s1573_s18, 3  ;;  %s1277_s22 = sshll.u32 %s1573_s18, 3  ;;  %vm819_vm1 = vcmask 261120  }
  0x12   : > { %v1508_v2 = vld [vmem:[%s1876_s1 + $0xf8] sm:$0xff]   ;;  %1350 = vmatprep.subr.bf16.mxu0 %v1507_v1  ;;  %v1512_v6 = vld [vmem:[%s1876_s1 + $0xf0] sm:$0xff]   ;;  %v1516_v10 = vld [vmem:[%s1876_s1 + $0xe8] sm:$0xff]   ;;  %vm1585_vm2 = vmmov (%p821_p6), 0  }
  0x13   : > { %v1509_v3 = vld [vmem:[%s1876_s1 + $0x38] sm:$0xff]   ;;  %1372 = vmatprep.subr.bf16.mxu1 %v1508_v2  ;;  %v1513_v7 = vld [vmem:[%s1876_s1 + $0x30] sm:$0xff]   ;;  %v1517_v11 = vld [vmem:[%s1876_s1 + $0x28] sm:$0xff]  }
  0x14   : > { %v1510_v4 = vld [vmem:[%s1876_s1 + $0xb8] sm:$0xff]   ;;  %1351 = vmatpush3.bf16.msra.mxu0 %v1509_v3  ;;  %v1514_v8 = vld [vmem:[%s1876_s1 + $0xb0] sm:$0xff]   ;;  %v1518_v12 = vld [vmem:[%s1876_s1 + $0xa8] sm:$0xff]  }
  0x15   : > { %1373 = vmatpush3.bf16.msra.mxu1 %v1510_v4  ;;  %1352 = vmatprep.subr.bf16.mxu0 %v1511_v5  ;;  %v1519_v13 = vld [vmem:[%s1876_s1 + $0x60] sm:$0xff]   ;;  %v1523_v17 = vld [vmem:[%s1876_s1 + $0x58] sm:$0xff]   ;;  %v1527_v21 = vld [vmem:[%s1876_s1 + $0x50] sm:$0xff]  }
  0x16   : > { %1374 = vmatprep.subr.bf16.mxu1 %v1512_v6  ;;  %v1520_v14 = vld [vmem:[%s1876_s1 + $0xe0] sm:$0xff]   ;;  %v1524_v18 = vld [vmem:[%s1876_s1 + $0xd8] sm:$0xff]   ;;  %v1528_v22 = vld [vmem:[%s1876_s1 + $0xd0] sm:$0xff]  }
  0x17   : > { %v1521_v15 = vld [vmem:[%s1876_s1 + $0x20] sm:$0xff]   ;;  %v1525_v19 = vld [vmem:[%s1876_s1 + $0x18] sm:$0xff]   ;;  %v1529_v23 = vld [vmem:[%s1876_s1 + $0x10] sm:$0xff]  }
  0x18   : > { %1353 = vmatpush3.bf16.msra.mxu0 %v1513_v7  ;;  %v1522_v16 = vld [vmem:[%s1876_s1 + $0xa0] sm:$0xff]   ;;  %v1526_v20 = vld [vmem:[%s1876_s1 + $0x98] sm:$0xff]   ;;  %v1530_v24 = vld [vmem:[%s1876_s1 + $0x90] sm:$0xff]  }
  0x19   : > { %1375 = vmatpush3.bf16.msra.mxu1 %v1514_v8  ;;  %1354 = vmatprep.subr.bf16.mxu0 %v1515_v9  ;;  %v1531_v25 = vld [vmem:[%s1876_s1 + $0x48] sm:$0xff]   ;;  %v1535_v29 = vld [vmem:[%s1876_s1 + $0x40] sm:$0xff]   ;;  %v302_v34 = vld [vmem:[%s1641_s26 + $0x18] sm:$0xff] }
  0x1a   : > { %1376 = vmatprep.subr.bf16.mxu1 %v1516_v10  ;;  %v1532_v26 = vld [vmem:[%s1876_s1 + $0xc8] sm:$0xff]   ;;  %v1536_v30 = vld [vmem:[%s1876_s1 + $0xc0] sm:$0xff]   ;;  %v308_v37 = vpack.c.bf16 %v302_v34, %v302_v34  ;;  %v301_v39 = vld [vmem:[%s1641_s26 + $0x10] sm:$0xff] }
  0x1b   : > { %v1533_v27 = vld [vmem:[%s1876_s1 + $0x8] sm:$0xff]   ;;  %v1537_v31 = vld [vmem:[%s1876_s1] sm:$0xff]   ;;  %v307_v40 = vpack.c.bf16 %v301_v39, %v301_v39  ;;  %v1539_v41 = vld [vmem:[%s1876_s1 + $0x178] sm:$0xff]  }
  0x1c   : > { %1355 = vmatpush3.bf16.msra.mxu0 %v1517_v11  ;;  %v1534_v28 = vld [vmem:[%s1876_s1 + $0x88] sm:$0xff]   ;;  %v1538_v32 = vld [vmem:[%s1876_s1 + $0x80] sm:$0xff]   ;;  %770 = vmatprep.mubr.bf16.mxu1 %v308_v37  ;;  %v1540_v42 = vld [vmem:[%s1876_s1 + $0x138] sm:$0xff]  }
  0x1d   : > { %1377 = vmatpush3.bf16.msra.mxu1 %v1518_v12  ;;  %1356 = vmatprep.subr.bf16.mxu0 %v1519_v13  ;;  %v300_v33 = vld [vmem:[%s1641_s26 + $0x8] sm:$0xff]  ;;  %v299_v35 = vld [vmem:[%s1641_s26] sm:$0xff]  ;;  %v1541_v43 = vld [vmem:[%s1876_s1 + $0x170] sm:$0xff]  }
  0x1e   : > { %1378 = vmatprep.subr.bf16.mxu1 %v1520_v14  ;;  %v306_v36 = vpack.c.bf16 %v300_v33, %v300_v33  ;;  %v305_v38 = vpack.c.bf16 %v299_v35, %v299_v35  ;;  %v1542_v44 = vld [vmem:[%s1876_s1 + $0x130] sm:$0xff]   ;;  %v1543_v45 = vld [vmem:[%s1876_s1 + $0x168] sm:$0xff]   ;;  %v1545_v47 = vld [vmem:[%s1876_s1 + $0x160] sm:$0xff]  }
  0x1f   : > { %v1544_v46 = vld [vmem:[%s1876_s1 + $0x128] sm:$0xff]   ;;  %v1546_v48 = vld [vmem:[%s1876_s1 + $0x120] sm:$0xff]   ;;  %v1547_v49 = vld [vmem:[%s1876_s1 + $0x158] sm:$0xff]  }
  0x20   : > { %1357 = vmatpush3.bf16.msra.mxu0 %v1521_v15  ;;  %730 = vmatprep.mubr.bf16.mxu0 %v306_v36  ;;  %v304_v50 = vld [vmem:[%s1641_s26 + $0x28] sm:$0xff]  ;;  %v1548_v51 = vld [vmem:[%s1876_s1 + $0x118] sm:$0xff]   ;;  %v1549_v53 = vld [vmem:[%s1876_s1 + $0x150] sm:$0xff]  }
  0x21   : > { %1379 = vmatpush3.bf16.msra.mxu1 %v1522_v16  ;;  %1358 = vmatprep.subr.bf16.mxu0 %v1523_v17  ;;  %v310_v52 = vpack.c.bf16 %v304_v50, %v304_v50  ;;  %v1550_v54 = vld [vmem:[%s1876_s1 + $0x110] sm:$0xff]   ;;  %v1551_v55 = vld [vmem:[%s1876_s1 + $0x148] sm:$0xff]   ;;  %v1553_v57 = vld [vmem:[%s1876_s1 + $0x140] sm:$0xff]  }
  0x22   : > { %1380 = vmatprep.subr.bf16.mxu1 %v1524_v18  ;;  %v1552_v56 = vld [vmem:[%s1876_s1 + $0x108] sm:$0xff]   ;;  %v1554_v58 = vld [vmem:[%s1876_s1 + $0x100] sm:$0xff]   ;;  %v846_v16 = vld [vmem:[%s1878_s3 + $0x18] sm:$0xff] (%p821_p6)  ;;  %v1584_v18 = vmov (%p821_p6), 0.0  }
  0x23   : > { %v303_v59 = vld [vmem:[%s1641_s26 + $0x20] sm:$0xff]  ;;  %s312_s26 = scalar_lea.vmem [#allocation2], %s1277_s22  ;;  %v1333_v17 = vld [vmem:[%s1878_s3 + $0x38] sm:$0xff] (%p821_p6)  ;;  %v1342_v33 = vld [vmem:[%s1878_s3 + $0x70] sm:$0xff] (%p821_p6) }
  0x24   : > { %1359 = vmatpush3.bf16.msra.mxu0 %v1525_v19  ;;  %v309_v60 = vpack.c.bf16 %v303_v59, %v303_v59  ;;  %v313_v11 = vld [vmem:[%s312_s26] sm:$0xff]  ;;  %v845_v19 = vld [vmem:[%s1878_s3 + $0x10] sm:$0xff] (%p821_p6)  ;;  %v1336_v34 = vld [vmem:[%s1878_s3 + $0x48] sm:$0xff] (%p821_p6) }
  0x25   : > { %1381 = vmatpush3.bf16.msra.mxu1 %v1526_v20  ;;  %1360 = vmatprep.subr.bf16.mxu0 %v1527_v21  ;;  %v1332_v20 = vld [vmem:[%s1878_s3 + $0x30] sm:$0xff] (%p821_p6)  ;;  %v1328_v21 = vld [vmem:[%s1877_s2] ss:$0 sm:$0xff] (%p821_p6)  ;;  %v1341_v35 = vld [vmem:[%s1878_s3 + $0x68] sm:$0xff] (%p821_p6) }
  0x26   : > { %1382 = vmatprep.subr.bf16.mxu1 %v1528_v22  ;;  %v844_v22 = vld [vmem:[%s1878_s3 + $0x8] sm:$0xff] (%p821_p6)  ;;  %v1340_v39 = vld [vmem:[%s1878_s3 + $0x60] sm:$0xff] (%p821_p6) }
  0x28   : > { %1361 = vmatpush3.bf16.msra.mxu0 %v1529_v23  ;;  %v1331_v23 = vld [vmem:[%s1878_s3 + $0x28] sm:$0xff] (%p821_p6) }
  0x29   : > { %1383 = vmatpush3.bf16.msra.mxu1 %v1530_v24  ;;  %1362 = vmatprep.subr.bf16.mxu0 %v1531_v25 }
  0x2a   : > { %1384 = vmatprep.subr.bf16.mxu1 %v1532_v26  ;;  %v843_v26 = vld [vmem:[%s1878_s3] sm:$0xff] (%p821_p6) }
  0x2c   : > { %1363 = vmatpush3.bf16.msra.mxu0 %v1533_v27 }
  0x2d   : > { %1385 = vmatpush3.bf16.msra.mxu1 %v1534_v28  ;;  %1364 = vmatprep.subr.bf16.mxu0 %v1535_v29  ;;  %v1330_v28 = vld [vmem:[%s1878_s3 + $0x20] sm:$0xff] (%p821_p6) }
  0x2e   : > { %1386 = vmatprep.subr.bf16.mxu1 %v1536_v30  ;;  %v1338_v30 = vld [vmem:[%s1878_s3 + $0x58] sm:$0xff] (%p821_p6) }
  0x30   : > { %1365 = vmatpush3.bf16.msra.mxu0 %v1537_v31  ;;  %v1343_v31 = vld [vmem:[%s1878_s3 + $0x78] sm:$0xff] (%p821_p6) }
  0x31   : > { %1387 = vmatpush3.bf16.msra.mxu1 %v1538_v32  ;;  %1394 = vmatprep.subr.bf16.mxu0 %v1539_v41  ;;  %v1337_v32 = vld [vmem:[%s1878_s3 + $0x50] sm:$0xff] (%p821_p6) }
  0x32   : > { %1447 = vmatprep.subr.mxu1 (%p821_p6), %v1584_v18 }
  0x33   : > { %731 = vmatmul.mubr.bf16.vlgmr.msra.gmra.mxu0 %v305_v38  ;;  %v1335_v38 = vld [vmem:[%s1878_s3 + $0x40] sm:$0xff] (%p821_p6) }
  0x34   : > { %771 = vmatmul.mubr.bf16.vlgmr.msra.gmra.mxu1 %v307_v40  ;;  %1395 = vmatpush3.bf16.msra.mxu0 %v1540_v42 }
  0x35   : > { %1396 = vmatprep.subr.bf16.mxu0 %v1541_v43  ;;  %810 = vmatprep.mubr.bf16.mxu0 %v310_v52 }
  0x36   : > { %1448 = vmatpush3.msra.mxu1 (%p821_p6), %v1333_v17  ;;  %1455 = vmatprep.mubr.msk.f32.mxu1 (%p821_p6), %vm1585_vm2, %v1584_v18 }
  0x37   : > { %1449 = vmatprep.subr.mxu1 (%p821_p6), %v1584_v18 }
  0x38   : > { %1397 = vmatpush3.bf16.msra.mxu0 %v1542_v44  ;;  %1450 = vmatpush3.msra.mxu1 (%p821_p6), %v1332_v20 }
  0x39   : > { %1398 = vmatprep.subr.bf16.mxu0 %v1543_v45  ;;  %1451 = vmatprep.subr.mxu1 (%p821_p6), %v1584_v18  ;;  %v1327_v45 = vld [vmem:[%s1879_s4] ss:$0 sm:$0xff] (%p821_p6) }
  0x3a   : > { %1452 = vmatpush3.msra.mxu1 (%p821_p6), %v1331_v23 }
  0x3b   : > { %1453 = vmatprep.subr.mxu1 (%p821_p6), %v1584_v18 }
  0x3c   : > { %1399 = vmatpush3.bf16.msra.mxu0 %v1544_v46  ;;  %1454 = vmatpush3.msra.mxu1 (%p821_p6), %v1330_v28 }
  0x3d   : > { %1400 = vmatprep.subr.bf16.mxu0 %v1545_v47  ;;  %1469 = vmatprep.subr.mxu1 (%p821_p6), %v1584_v18 }
  0x40   : > { %1401 = vmatpush3.bf16.msra.mxu0 %v1546_v48  ;;  %v1168_v48 = vlaneseq (%p821_p6) }
  0x41   : > { %1402 = vmatprep.subr.bf16.mxu0 %v1547_v49 }
  0x42   : > { %v1169_v52 = vand.u32 (%p821_p6), 127, %v1168_v48 }
  0x44   : > { %1403 = vmatpush3.bf16.msra.mxu0 %v1548_v51  ;;  %vm1170_vm3 = vcmp.lt.s32.totalorder (%p821_p6), %v1169_v52, 2 }
  0x45   : > { %1404 = vmatprep.subr.bf16.mxu0 %v1549_v53 }
  0x48   : > { %1405 = vmatpush3.bf16.msra.mxu0 %v1550_v54 }
  0x49   : > { %1406 = vmatprep.subr.bf16.mxu0 %v1551_v55 }
  0x4c   : > { %1407 = vmatpush3.bf16.msra.mxu0 %v1552_v56 }
  0x4d   : > { %1408 = vmatprep.subr.bf16.mxu0 %v1553_v57 }
  0x50   : > { %1409 = vmatpush3.bf16.msra.mxu0 %v1554_v58 }
  0x51   : > { %1436 = vmatprep.subr.mxu0 (%p821_p6), %v1584_v18 }
  0x53   : > { %811 = vmatmul.mubr.bf16.vlgmr.msra.gmra.mxu0 %v309_v60 }
  0x54   : > { %1437 = vmatpush3.msra.mxu0 (%p821_p6), %v846_v16  ;;  %1444 = vmatprep.mubr.msk.f32.mxu0 (%p821_p6), %vm1585_vm2, %v1584_v18 }
  0x55   : > { %1438 = vmatprep.subr.mxu0 (%p821_p6), %v1584_v18 }
  0x56   : > { %1439 = vmatpush3.msra.mxu0 (%p821_p6), %v845_v19 }
  0x57   : > { %1440 = vmatprep.subr.mxu0 (%p821_p6), %v1584_v18 }
  0x58   : > { %1441 = vmatpush3.msra.mxu0 (%p821_p6), %v844_v22 }
  0x59   : > { %1442 = vmatprep.subr.mxu0 (%p821_p6), %v1584_v18 }
  0x5a   : > { %1443 = vmatpush3.msra.mxu0 (%p821_p6), %v843_v26 }
  0x5b   : > { %1458 = vmatprep.subr.mxu0 (%p821_p6), %v1584_v18 }
  0xf3   : > { %v1366_v61 = vpop.f32.mrf.mxu0 }
  0xf4   : > { %v1388_v62 = vpop.f32.mrf.mxu1 }
  0xf5   : > { %v1367_v63 = vpop.f32.mrf.mxu0 }
  0xf6   : > { %v1389_v0 = vpop.f32.mrf.mxu1  ;;  %v1368_v5 = vadd.f32 %v1367_v63, %v1366_v61 }
  0xf7   : > { %v1369_v1 = vpop.f32.mrf.mxu0  ;;  %v1390_v6 = vadd.f32 %v1389_v0, %v1388_v62 }
  0xf8   : > { %v1391_v2 = vpop.f32.mrf.mxu1 }
  0xf9   : > { %v1370_v3 = vpop.f32.mrf.mxu0  ;;  %v773_v9 = vadd.f32 %v1390_v6, %v1368_v5 }
  0xfa   : > { %v1392_v4 = vpop.f32.mrf.mxu1 }
 0x113   : > { %v1410_v7 = vpop.f32.mrf.mxu0 }
 0x115   : > { %v1411_v8 = vpop.f32.mrf.mxu0 }
 0x116   : > { %v1412_v10 = vadd.f32 %v1411_v8, %v1410_v7 }
 0x117   : > { %v1413_v12 = vpop.f32.mrf.mxu0 }
 0x118   : > { %v813_v13 = vadd.f32 %v1412_v10, %v773_v9  ;;  %825 = sbr.rel (!%p821_p6) target bundleno = 818 (0x332), region = 48 }
 0x119   : > { %v1414_v14 = vpop.f32.mrf.mxu0 }
 0x11a   : > { %v818_v15 = vadd.f32 %v813_v13, %v313_v11 }
 0x11c   : > { %820 = vst.msk [vmem:[%s312_s26] sm:$0xff] %vm819_vm1, %v818_v15 }
 0x123   : > { %v835_v24 = vld [vmem:[#allocation2] sm:$0xff]  ;;  %v922_v25 = vld [vmem:[#allocation2 + $0x8] sm:$0xff]  ;;  %v1004_v36 = vld [vmem:[#allocation2 + $0x10] sm:$0xff] }
 0x124   : > { %v842_v27 = vadd.f32 %v1328_v21, %v835_v24  ;;  %v923_v29 = vadd.f32 %v1328_v21, %v922_v25  ;;  %v1086_v37 = vld [vmem:[#allocation2 + $0x18] sm:$0xff]  ;;  %v1005_v40 = vadd.f32 %v1328_v21, %v1004_v36 }
 0x125   : > { %v1087_v41 = vadd.f32 %v1328_v21, %v1086_v37 }
 0x126   : > { %1445 = vmatmul.mubr.msk.f32.vlgmr.msra.gmra.mxu0 %vm819_vm1, %v842_v27  ;;  %1456 = vmatmul.mubr.msk.f32.vlgmr.msra.gmra.mxu1 %vm819_vm1, %v923_v29 }
 0x127   : > { %1459 = vmatpush3.msra.mxu0 %v1338_v30  ;;  %1470 = vmatpush3.msra.mxu1 %v1343_v31 }
 0x128   : > { %1460 = vmatprep.subr.mxu0 %v1584_v18  ;;  %1471 = vmatprep.subr.mxu1 %v1584_v18 }
 0x129   : > { %1461 = vmatpush3.msra.mxu0 %v1337_v32  ;;  %1472 = vmatpush3.msra.mxu1 %v1342_v33 }
 0x12a   : > { %1462 = vmatprep.subr.mxu0 %v1584_v18  ;;  %1473 = vmatprep.subr.mxu1 %v1584_v18 }
 0x12b   : > { %1463 = vmatpush3.msra.mxu0 %v1336_v34  ;;  %1474 = vmatpush3.msra.mxu1 %v1341_v35 }
 0x12c   : > { %1464 = vmatprep.subr.mxu0 %v1584_v18  ;;  %1475 = vmatprep.subr.mxu1 %v1584_v18 }
 0x12d   : > { %1465 = vmatpush3.msra.mxu0 %v1335_v38  ;;  %1466 = vmatprep.mubr.msk.f32.mxu0 %vm1585_vm2, %v1584_v18 }
 0x12e   : > { %1476 = vmatpush3.msra.mxu1 %v1340_v39  ;;  %1477 = vmatprep.mubr.msk.f32.mxu1 %vm1585_vm2, %v1584_v18 }
 0x12f   : > { %1467 = vmatmul.mubr.msk.f32.vlgmr.msra.gmra.mxu0 %vm819_vm1, %v1005_v40  ;;  %1478 = vmatmul.mubr.msk.f32.vlgmr.msra.gmra.mxu1 %vm819_vm1, %v1087_v41 }
 0x1e6   : > { %v916_v42 = vpop.f32.mrf.mxu0  ;;  %v998_v43 = vpop.f32.mrf.mxu1 }
 0x1e7   : > { %v920_v47 = vadd.f32 %v1327_v45, %v916_v42 }
 0x1e8   : > { %v1446_v44 = vpop.f32.mrf.mxu0  ;;  %v1457_v46 = vpop.f32.mrf.mxu1 }
 0x1e9   : > { %v1002_v49 = vadd.f32 %v998_v43, %v920_v47 }
 0x1ef   : > { %v1080_v50 = vpop.f32.mrf.mxu0  ;;  %v1162_v51 = vpop.f32.mrf.mxu1 }
 0x1f0   : > { %v1084_v53 = vadd.f32 %v1080_v50, %v1002_v49 }
 0x1f1   : > { %v1468_v54 = vpop.f32.mrf.mxu0  ;;  %v1479_v55 = vpop.f32.mrf.mxu1 }
 0x1f2   : > { %v1166_v56 = vadd.f32 %v1162_v51, %v1084_v53 }
 0x1f4   : > { %v1167_v57 = vmax.f32 %v1166_v56, 0.0 }
 0x1f6   : > { %v1171_v58 = vsel %vm1170_vm3, %v1167_v57, -inf }
 0x1f7   : > { %1172 = vmax.xlane.f32.xlu0 %v1171_v58 }
 0x280   : > { %v1173_v59 = vpop.xlane.xlu0 %1172 }
 0x281   : > { %v1174_v60 = vsub.f32 %v1167_v57, %v1173_v59 }
 0x283   : > { %v1175_v61 = vmul.f32 1.442695, %v1174_v60 }
 0x285   : > { %1555 = vpow2.f32 %v1175_v61 }
 0x292   : > { %v1556_v62 = vpop.eup %1555 }
 0x293   : > { %v1177_v63 = vsel %vm1170_vm3, %v1556_v62, 0.0 }
 0x294   : > { %1178 = vadd.xlane.f32.xlu0 %v1177_v63 }
 0x31d   : > { %v1179_v0 = vpop.xlane.xlu0 %1178 }
 0x31e   : > { %1557 = vlog2.f32 %v1179_v0 }
 0x32b   : > { %v1558_v1 = vpop.eup %1557 }
 0x32c   : > { %v1181_v2 = vmul.f32 0.6931472, %v1558_v1 }
 0x32e   : > { %v1182_v3 = vsub.f32 %v1174_v60, %v1181_v2 }
 0x330   : > { %v1183_v4 = vsel %vm1170_vm3, %v1182_v3, 0.0 }
 0x331   : > { %1184 = vst [vmem:[%s1880_s5] sm:$0xff] %v1183_v4 }
 0x332 PF: > { %s15_s20 = sadd.s32 1, %s1581_s20   ;;  %s1881_s18 = smov %s1577_s19 }
 0x333   : > { %p12_p7 = scmp.ge.s32.totalorder %s15_s20, 6   ;;  %s1882_s19 = smov %s1884_s21 }
 0x335   :  { %14 = sbr.rel (!%p12_p7) target bundleno = 2 (0x2), region = 88 }

</bundles_post_ra>
